<compile_context>
chip_gen: v6e
topology: v6e:2x2x1
jax: 0.10.0
libtpu: 0.0.40
codegen_flags: <defaults>
</compile_context>

<pallas_src>
import functools

import jax
import jax.numpy as jnp
from jax.experimental import pallas as pl
from jax.experimental.pallas import tpu as pltpu


def _round_up(a, b):
    return ((a + b - 1) // b) * b


def _gbq_match_kernel(lo_ref, nch_ref, pt_ref, vox_ref, out_ref, *, vm):
    """Banded equality match for one point tile.

    lo_ref  : (n_tiles,) int32 SMEM  first voxel chunk overlapping this tile
    nch_ref : (n_tiles,) int32 SMEM  number of voxel chunks to scan
    pt_ref  : (1, tn)    int32       sorted point linear indices (lane-dense)
    vox_ref : (8, Mp)    int32       sorted voxel linear indices, 8 replicated rows
                                     (lane-dense; padding value -1 never matches)
    out_ref : (1, tn)    int32       per-point sorted-voxel position, -1 if absent
    """
    n = pl.program_id(0)
    pt = pt_ref[...]                                   # (1, tn)
    tn = pt.shape[1]
    lo_chunk = lo_ref[n]
    nch = nch_ref[n]

    # Loop-invariant sublane iota (hoisted: JAX does not CSE broadcasts).
    row_iota = jax.lax.broadcasted_iota(jnp.int32, (vm, tn), 0)

    def body(i, best):
        off = pl.multiple_of((lo_chunk + i) * vm, vm)
        vl8 = vox_ref[:, pl.ds(off, vm)]               # (8, vm) lane-dense load
        vl_col = jnp.transpose(vl8, (1, 0))[:, 0:1]    # (vm, 1) XLU relayout
        match = vl_col == pt                           # (vm, tn) cross compare (VPU)
        local = jnp.where(match, row_iota, -1)         # (vm, tn)
        lmax = jnp.max(local, axis=0, keepdims=True)   # (1, tn) sublane reduce
        gmax = jnp.where(lmax >= 0, lmax + off, -1)    # globalize on reduced result
        return jnp.maximum(best, gmax)

    best = jax.lax.fori_loop(0, nch, body, jnp.full((1, tn), -1, jnp.int32))
    out_ref[...] = best                                # lane-dense int32 store


def getballquery_forward(voxel_feats, voxel_coors, pts_coors,
                         voxel_size=(0.2, 0.2, 4.0),
                         point_cloud_range=(0.0, -40.0, -3.0, 70.4, 40.0, 1.0),
                         tn=512, vm=512):
    """Returns center_per_point: (N_pts, C) f32 voxel mean feature per point."""
    M, C = voxel_feats.shape
    N = pts_coors.shape[0]

    canvas_z = int((point_cloud_range[5] - point_cloud_range[2]) / voxel_size[2])
    canvas_y = int((point_cloud_range[4] - point_cloud_range[1]) / voxel_size[1])
    canvas_x = int((point_cloud_range[3] - point_cloud_range[0]) / voxel_size[0])
    mult1 = canvas_y * canvas_x
    mult0 = canvas_z * mult1
    mult2 = canvas_x
    # NOTE: assumes (batch * canvas volume) fits int32 (140800 cells per sample here).

    def lin(coors):
        coors = coors.astype(jnp.int32)
        return (coors[:, 0] * mult0 + coors[:, 1] * mult1
                + coors[:, 2] * mult2 + coors[:, 3])

    vox_lin = lin(voxel_coors)                         # (M,)
    pt_lin = lin(pts_coors)                            # (N,)

    # ---- wrapper-side sorting (XLA) -------------------------------------
    vox_order = jnp.argsort(vox_lin)
    vox_sorted = vox_lin[vox_order]                    # ascending, unique (DV-SECOND)
    pt_order = jnp.argsort(pt_lin)
    pt_sorted = pt_lin[pt_order]

    # ---- tiling ----------------------------------------------------------
    tn_eff = min(tn, _round_up(N, 128))                # lane-dense point tile
    if _round_up(N, tn_eff) // tn_eff < 2 and tn_eff > 128:
        tn_eff = _round_up(tn_eff // 2, 128)           # >=2 grid steps (v7x megacore)
    Np = _round_up(N, tn_eff)
    n_tiles = Np // tn_eff

    vm_eff = min(vm, _round_up(M, 128))                # in-kernel voxel chunk
    Mp = _round_up(M, vm_eff)

    # ---- padded, lane-dense tables ---------------------------------------
    int_max = jnp.iinfo(jnp.int32).max
    pt_pad_1d = jnp.pad(pt_sorted, (0, Np - N), constant_values=int_max)
    pt_pad = pt_pad_1d.reshape(1, Np)                                      # (1, Np)
    vox_pad = jnp.pad(vox_sorted, (0, Mp - M), constant_values=-1)
    vox_tab = jnp.broadcast_to(vox_pad.reshape(1, Mp), (8, Mp))            # (8, Mp)

    # ---- per-tile voxel band -> chunk range (scalar prefetch) ------------
    pt_tiles = pt_pad_1d.reshape(n_tiles, tn_eff)
    tile_min = pt_tiles[:, 0]
    tile_max = pt_tiles[:, -1]
    lo = jnp.searchsorted(vox_sorted, tile_min, side='left').astype(jnp.int32)
    hi = jnp.searchsorted(vox_sorted, tile_max, side='right').astype(jnp.int32)
    lo_chunk = (lo // vm_eff).astype(jnp.int32)
    nch = jnp.maximum((hi + vm_eff - 1) // vm_eff - lo_chunk, 0).astype(jnp.int32)

    kernel = functools.partial(_gbq_match_kernel, vm=vm_eff)

    cost = pl.CostEstimate(
        flops=4 * Np * 2 * vm_eff,                     # ~band of <=2 chunks per point
        transcendentals=0,
        bytes_accessed=4 * Np * 2 + 4 * 8 * Mp + 8 * n_tiles)

    jpos = pl.pallas_call(
        kernel,
        out_shape=jax.ShapeDtypeStruct((1, Np), jnp.int32),
        grid_spec=pltpu.PrefetchScalarGridSpec(
            num_scalar_prefetch=2,
            grid=(n_tiles,),
            in_specs=[
                pl.BlockSpec((1, tn_eff), lambda n, lo_r, nc_r: (0, n)),   # points
                pl.BlockSpec((8, Mp), lambda n, lo_r, nc_r: (0, 0)),       # voxel table
            ],
            out_specs=pl.BlockSpec((1, tn_eff), lambda n, lo_r, nc_r: (0, n)),
        ),
        compiler_params=pltpu.CompilerParams(
            dimension_semantics=("parallel",)),
        cost_estimate=cost,
    )(lo_chunk, nch, pt_pad, vox_tab)

    # ---- unsort + feature gather in XLA (no feats table in the kernel) ---
    j_sorted = jpos[0, :N]                                         # sorted-point order
    j = jnp.zeros((N,), jnp.int32).at[pt_order].set(j_sorted)      # original order
    found = j >= 0
    j_safe = jnp.where(found, j, 0)
    voxel_inds = jnp.where(found, vox_order[j_safe].astype(jnp.int32), 0)
    return voxel_feats.astype(jnp.float32)[voxel_inds]             # (N, C)


def _reference(voxel_feats, voxel_coors, pts_coors, voxel_size, pc_range):
    """Pure-JAX replica of the PyTorch forward (canvas scatter/gather)."""
    canvas_z = int((pc_range[5] - pc_range[2]) / voxel_size[2])
    canvas_y = int((pc_range[4] - pc_range[1]) / voxel_size[1])
    canvas_x = int((pc_range[3] - pc_range[0]) / voxel_size[0])
    batch_size = int(voxel_coors[-1, 0]) + 1
    canvas_len = canvas_z * canvas_y * canvas_x * batch_size

    def lin(c):
        return (c[:, 0] * canvas_z * canvas_y * canvas_x
                + c[:, 1] * canvas_y * canvas_x
                + c[:, 2] * canvas_x + c[:, 3])

    canvas = jnp.zeros((canvas_len,), jnp.int32)
    canvas = canvas.at[lin(voxel_coors)].set(
        jnp.arange(voxel_feats.shape[0], dtype=jnp.int32))
    voxel_inds = canvas[lin(pts_coors)]
    return voxel_feats[voxel_inds]


if __name__ == "__main__":
    key = jax.random.PRNGKey(0)
    voxel_size = (0.2, 0.2, 4.0)
    pc_range = (0.0, -40.0, -3.0, 70.4, 40.0, 1.0)

    canvas_z = int((pc_range[5] - pc_range[2]) / voxel_size[2])   # 1
    canvas_y = int((pc_range[4] - pc_range[1]) / voxel_size[1])   # 400
    canvas_x = int((pc_range[3] - pc_range[0]) / voxel_size[0])   # 352
    batch = 2
    canvas_len = canvas_z * canvas_y * canvas_x * batch

    M, N, C = 100, 300, 4          # voxels, points, feature channels
    K_missing = 8                  # points whose voxel is absent -> canvas default 0

    k1, k2, k3 = jax.random.split(key, 3)

    # Distinct linearized canvas slots: first M for voxels, rest for "missing" points.
    lin_all = jax.random.choice(k1, canvas_len, (M + K_missing,), replace=False)
    lin_vox = jnp.sort(lin_all[:M])          # sorted -> coors[-1, 0] is max batch idx
    lin_miss = lin_all[M:]

    def decompose(lin):
        lin = lin.astype(jnp.int32)
        b = lin // (canvas_z * canvas_y * canvas_x)
        r = lin % (canvas_z * canvas_y * canvas_x)
        z = r // (canvas_y * canvas_x)
        r = r % (canvas_y * canvas_x)
        y = r // canvas_x
        x = r % canvas_x
        return jnp.stack([b, z, y, x], axis=1).astype(jnp.int32)

    voxel_coors = decompose(lin_vox)                               # (M, 4)
    voxel_feats = jax.random.normal(k3, (M, C), jnp.float32)       # (M, C)

    pick = jax.random.randint(k2, (N,), 0, M)
    pts_coors = voxel_coors[pick]                                  # (N, 4)
    pts_coors = pts_coors.at[:K_missing].set(decompose(lin_miss))  # a few misses

    out = getballquery_forward(voxel_feats, voxel_coors, pts_coors,
                               voxel_size, pc_range)
    out = jax.block_until_ready(out)

    ref = _reference(voxel_feats, voxel_coors, pts_coors, voxel_size, pc_range)
    assert out.shape == (N, C) and out.dtype == jnp.float32
    assert jnp.allclose(out, ref, atol=1e-5), "mismatch vs reference"

    print("KERNEL_OK")
</pallas_src>

<mosaic_0001>
module attributes {stable_mosaic.version = 11 : i64} {
  func.func @_gbq_match_kernel(%arg0: i32, %arg1: memref<2xi32, #tpu.memory_space<smem>>, %arg2: memref<2xi32, #tpu.memory_space<smem>>, %arg3: memref<1x256xi32, #tpu.memory_space<vmem>>, %arg4: memref<8x128xi32, #tpu.memory_space<vmem>>, %arg5: memref<1x256xi32, #tpu.memory_space<vmem>>) attributes {dimension_semantics = [#tpu.dimension_semantics<parallel>], iteration_bounds = array<i64: 2>, scalar_prefetch = 2 : i64, scratch_operands = 0 : i64, tpu.core_type = #tpu.core_type<tc>, window_params = [{transform_indices = @transform_0, window_bounds = array<i64: 1, 256>}, {pipeline_mode = #tpu.pipeline_mode<synchronous>, transform_indices = @transform_1, window_bounds = array<i64: 8, 128>}, {transform_indices = @transform_2, window_bounds = array<i64: 1, 256>}]} {
    %c0 = arith.constant 0 : index
    %c0_0 = arith.constant 0 : index
    %0 = vector.load %arg3[%c0, %c0_0] : memref<1x256xi32, #tpu.memory_space<vmem>>, vector<1x256xi32>
    %1 = arith.index_cast %arg0 : i32 to index
    %2 = memref.load %arg1[%1] : memref<2xi32, #tpu.memory_space<smem>>
    %3 = arith.index_cast %arg0 : i32 to index
    %4 = memref.load %arg2[%3] : memref<2xi32, #tpu.memory_space<smem>>
    %5 = tpu.iota {dimensions = array<i32: 0>} : vector<128x256xi32>
    %c-1_i32 = arith.constant -1 : i32
    %6 = vector.broadcast %c-1_i32 : i32 to vector<1x256xi32>
    %c0_i32 = arith.constant 0 : i32
    %7 = arith.subi %4, %c0_i32 : i32
    %8 = arith.addi %c0_i32, %7 : i32
    %c1_i32 = arith.constant 1 : i32
    %9 = scf.for %arg6 = %c0_i32 to %8 step %c1_i32 iter_args(%arg7 = %6) -> (vector<1x256xi32>)  : i32 {
      %11 = arith.addi %2, %arg6 : i32
      %c128_i32 = arith.constant 128 : i32
      %12 = arith.muli %11, %c128_i32 : i32
      %13 = tpu.assume_multiple %12, 128 : i32
      %c0_3 = arith.constant 0 : index
      %14 = arith.index_cast %13 : i32 to index
      %15 = vector.load %arg4[%c0_3, %14] : memref<8x128xi32, #tpu.memory_space<vmem>>, vector<8x128xi32>
      %16 = tpu.transpose %15, [1, 0] : vector<8x128xi32> -> vector<128x8xi32>
      %17 = vector.extract_strided_slice %16 {offsets = [0, 0], sizes = [128, 1], strides = [1, 1]} : vector<128x8xi32> to vector<128x1xi32>
      %18 = vector.broadcast %17 : vector<128x1xi32> to vector<128x256xi32>
      %19 = vector.broadcast %0 : vector<1x256xi32> to vector<128x256xi32>
      %20 = arith.cmpi eq, %18, %19 : vector<128x256xi32>
      %c-1_i32_4 = arith.constant -1 : i32
      %21 = vector.broadcast %c-1_i32_4 : i32 to vector<128x256xi32>
      %22 = arith.select %20, %5, %21 : vector<128x256xi1>, vector<128x256xi32>
      %cst = arith.constant dense<-2147483648> : vector<256xi32>
      %23 = vector.multi_reduction <maxsi>, %22, %cst [0] : vector<128x256xi32> to vector<256xi32>
      %24 = vector.shape_cast %23 : vector<256xi32> to vector<1x256xi32>
      %c0_i32_5 = arith.constant 0 : i32
      %25 = vector.broadcast %c0_i32_5 : i32 to vector<1x256xi32>
      %26 = arith.cmpi sge, %24, %25 : vector<1x256xi32>
      %27 = vector.broadcast %13 : i32 to vector<1x256xi32>
      %28 = arith.addi %24, %27 : vector<1x256xi32>
      %c-1_i32_6 = arith.constant -1 : i32
      %29 = vector.broadcast %c-1_i32_6 : i32 to vector<1x256xi32>
      %30 = arith.select %26, %28, %29 : vector<1x256xi1>, vector<1x256xi32>
      %31 = arith.maxsi %arg7, %30 : vector<1x256xi32>
      scf.yield %31 : vector<1x256xi32>
    }
    %c0_1 = arith.constant 0 : index
    %c0_2 = arith.constant 0 : index
    %10 = vector.load %arg5[%c0_1, %c0_2] : memref<1x256xi32, #tpu.memory_space<vmem>>, vector<1x256xi32>
    tpu.vector_store %arg5[%c0_1, %c0_2], %9 {strides = array<i32>} : memref<1x256xi32, #tpu.memory_space<vmem>>, vector<1x256xi32>,
    return
  }
  func.func @transform_0(%arg0: i32, %arg1: memref<2xi32, #tpu.memory_space<smem>>, %arg2: memref<2xi32, #tpu.memory_space<smem>>) -> (i32, i32) {
    %c0_i32 = arith.constant 0 : i32
    %c0_i32_0 = arith.constant 0 : i32
    return %c0_i32, %arg0 : i32, i32
  }
  func.func @transform_1(%arg0: i32, %arg1: memref<2xi32, #tpu.memory_space<smem>>, %arg2: memref<2xi32, #tpu.memory_space<smem>>) -> (i32, i32) {
    %c0_i32 = arith.constant 0 : i32
    %c0_i32_0 = arith.constant 0 : i32
    %c0_i32_1 = arith.constant 0 : i32
    return %c0_i32, %c0_i32_0 : i32, i32
  }
  func.func @transform_2(%arg0: i32, %arg1: memref<2xi32, #tpu.memory_space<smem>>, %arg2: memref<2xi32, #tpu.memory_space<smem>>) -> (i32, i32) {
    %c0_i32 = arith.constant 0 : i32
    %c0_i32_0 = arith.constant 0 : i32
    return %c0_i32, %arg0 : i32, i32
  }
}

</mosaic_0001>

<bundles_post_ra>
// kernel: tpu_custom_call.1
= control target key start
LH: loop header
LB: loop body
LE: loop exit
PB: predicated region body
PF: predicated region fallthrough
CT: control target
= control target key end

     0   :  { %s896_s15 = smov [#allocation3]   ;;  %s1278_s0 = inlined_call_operand.hbm [shape: s32[2], index: 0, kind: input, shape index: {}]   ;;  %s1279_s2 = inlined_call_operand.hbm [shape: s32[1,512], index: 2, kind: input, shape index: {}]   ;;  %s1280_s3 = inlined_call_operand.hbm [shape: s32[8,128], index: 3, kind: input, shape index: {}]   ;;  %s1281_s4 = inlined_call_operand.hbm [shape: s32[1,512], index: 4, kind: output, shape index: {}]   ;;  %s1282_s1 = inlined_call_operand.vmem [shape: s32[2], index: 1, kind: input, shape index: {}]  }
   0x1   :  { %10 = dma.hbm_to_smem %s1278_s0, 16, %s896_s15, [#allocation2] }
   0x2   :  { %s11_s20 = sshll.u32 %s1282_s1, 4  ;;  %s12_s20 = int_to_ptr.vmem [resolvable:$true] %s11_s20 }
   0x3   :  { %s718_s21 = scalar_lea.vmem %s12_s20, 16  ;;  %p723_p1 = scmp.lt.s32.totalorder %s12_s20, %s12_s20 }
   0x4   :  { %p719_p0 = scmp.ne.s32.totalorder %s12_s20, %s718_s21  ;;  %p724_p2 = scmp.lt.s32.totalorder %s718_s21, %s718_s21 }
   0x6   :  { %p725_p3 = por %p724_p2, %p723_p1 }
   0x8   :  { %p726_p4 = pnand %p725_p3, %p719_p0 }
   0xa   :  { %729 = shalt.err (!%p726_p4)  }
   0xb   :  { %s897_s22 = smov [#allocation4]  }
   0xc   :  { %14 = dma.vmem_to_smem %s12_s20, 16, %s897_s22, [#allocation2] }
   0xd   :  { %846 = dma.done.wait [#allocation2], 32 }
   0xe   :  { %847 = vsyncadd [#allocation2], 4294967264 }
   0xf   :  { %16 = sfence }
  0x10   :  { %17 = vsyncpa [#allocation6], 0 }
  0x11   :  { %19 = vsyncpa [#allocation6 + $0x1], 0 }
  0x12   :  { %20 = vsyncpa [#allocation9], 0 }
  0x13   :  { %21 = vsyncpa [#allocation7], 0 }
  0x14   :  { %23 = vsyncpa [#allocation7 + $0x1], 0  ;;  %s934_s0 = smov 0   ;;  %s936_s1 = smov 0  }
  0x15   :  { %s938_s23 = smov 0   ;;  %s940_s24 = smov 0  }
  0x16 LB: > { %s955_s25 = sadd.s32 4294967295, %s874_s24   ;;  %s587_s26 = sadd.s32 4294967294, %s874_s24   ;;  %s874_s24 = sphi %s940_s24, %s1309_s24   ;;  %s870_s23 = sphi %s938_s23, %s1308_s23   ;;  %s866_s1 = sphi %s936_s1, %s1307_s1   ;;  %s862_s0 = sphi %s934_s0, %s1306_s0  }
  0x17   : > { %p49_p5 = scmp.ne.s32.totalorder %s866_s1, %s862_s0  ;;  %p1283_p6 = scmp.eq.s32.totalorder %s955_s25, 0 }
  0x18   : > { %p100_p8 = scmp.eq.s32.totalorder %s587_s26, 1  ;;  %p588_p10 = scmp.ge.s32.totalorder %s874_s24, 1 }
  0x19   : > { %p964_p9 = por %p1283_p6, %p49_p5  ;;  %p107_p12 = scmp.lt.s32.totalorder %s874_s24, 3 }
  0x1a   : > { %p969_p11 = por %p100_p8, %p49_p5  ;;  %s898_s30 = smov [#allocation8]  }
  0x1b   : > { %s1287_s27 = scalar_select %p964_p9, 1, 0 }
  0x1c   : > { %s1288_s28 = scalar_select %p969_p11, 1, 0 }
  0x1d   : > { %p974_p13 = pnand %p588_p10, %p107_p12  ;;  %s120_s5 = sshll.u32 %s898_s30, 4  ;;  %s121_s5 = int_to_ptr.vmem [resolvable:$true] %s120_s5 }
  0x1e   : > { %s982_s6 = sadd.s32 1, %s874_s24   ;;  %s36_s10 = sadd.s32 1, %s870_s23 }
  0x1f   : > { %s1289_s29 = scalar_select %p974_p13, 1, 0 }
  0x20   : > { %p615_p1 = pneg %p974_p13  ;;  %s33_s8 = ssub.s32 %s874_s24, %s982_s6 }
  0x21   : > { %p992_p3 = scmp.eq.s32.totalorder %s33_s8, 0  ;;  %p43_p4 = scmp.ne.s32.totalorder %s870_s23, %s866_s1 }
  0x22   : > { %p986_p2 = pnand %p615_p1, %p1283_p6  ;;  %s741_s11 = scalar_lea.vmem %s121_s5, 128 }
  0x23   : > { %p742_p8 = scmp.ne.s32.totalorder %s121_s5, %s741_s11  ;;  %p749_p0 = scmp.lt.s32.totalorder %s121_s5, %s121_s5 }
  0x24   : > { %p732_p5 = pneg %p986_p2  ;;  %p750_p7 = scmp.lt.s32.totalorder %s741_s11, %s741_s11 }
  0x26   : > { %p744_p10 = pnand %p742_p8, %p732_p5  ;;  %p751_p1 = por %p750_p7, %p749_p0 }
  0x28   : > { %p745_p12 = pneg %p744_p10 }
  0x2a   : > { %p752_p6 = pnand %p751_p1, %p745_p12 }
  0x2c   : > { %755 = shalt.err (!%p752_p6)
}
  0x2d   : > { %618 = dma.hbm_to_vmem [thread:$0]  (!%p986_p2), %s1280_s3, 128, %s121_s5, [#allocation9]  }
  0x2e   : > { %s1009_s14 = scalar_select %p992_p3, %s870_s23, %s36_s10  }
  0x2f   : > { %p44_p6 = scmp.eq.s32.totalorder %s874_s24, 0  ;;  %p1292_p7 = scmp.eq.s32.totalorder %s955_s25, 1 }
  0x30   : > { %p628_p5 = scmp.lt.s32.totalorder %s874_s24, 2  ;;  %s131_s16 = sand.u32 1, %s870_s23  }
  0x31   : > { %p1017_p0 = por %p1292_p7, %p43_p4  ;;  %p45_p8 = por %p44_p6, %p43_p4 }
  0x32   : > { %s591_s17 = sshll.u32 %s131_s16, 1  ;;  %s605_s18 = sshll.u32 %s874_s24, 5 }
  0x33   : > { %s1293_s15 = scalar_select %p1017_p0, 1, 0 }
  0x34   : > { %s1030_s21 = scalar_lea.hbm %s1279_s2, %s605_s18  ;;  %s135_s22 = scalar_lea.vmem [#allocation5], %s591_s17 }
  0x35   : > { %s143_s26 = sshll.u32 %s135_s22, 4  ;;  %p1032_p2 = pnand %p628_p5, %p45_p8  ;;  %s144_s26 = int_to_ptr.vmem [resolvable:$true] %s143_s26 }
  0x36   : > { %s132_s5 = scalar_lea.sflag [#allocation6], %s131_s16  ;;  %s756_s7 = scalar_lea.hbm %s1030_s21, 32 }
  0x37   : > { %p757_p3 = scmp.ne.s32.totalorder %s1030_s21, %s756_s7  ;;  %p758_p4 = pneg %p1032_p2 }
  0x38   : > { %s761_s10 = scalar_lea.hbm %s1279_s2, 64  ;;  %p762_p1 = scmp.lt.s32.totalorder %s1030_s21, %s1279_s2 }
  0x39   : > { %p759_p10 = pnand %p758_p4, %p757_p3  ;;  %p763_p6 = scmp.lt.s32.totalorder %s761_s10, %s756_s7 }
  0x3b   : > { %p760_p12 = pneg %p759_p10  ;;  %p764_p7 = por %p763_p6, %p762_p1 }
  0x3d   : > { %p765_p5 = pnand %p764_p7, %p760_p12 }
  0x3f   : > { %768 = shalt.err (!%p765_p5)
}
  0x40   : > { %s769_s13 = scalar_lea.vmem %s144_s26, 32  ;;  %s899_s16 = smov [#allocation5]  }
  0x41   : > { %p770_p8 = scmp.ne.s32.totalorder %s144_s26, %s769_s13  ;;  %s774_s17 = sshll.u32 %s899_s16, 4  ;;  %s775_s17 = int_to_ptr.vmem [resolvable:$false] %s774_s17 }
  0x42   : > { %s776_s18 = scalar_lea.vmem %s775_s17, 64  ;;  %p777_p3 = scmp.lt.s32.totalorder %s144_s26, %s775_s17 }
  0x43   : > { %p772_p11 = pnand %p770_p8, %p758_p4  ;;  %p778_p10 = scmp.lt.s32.totalorder %s776_s18, %s769_s13 }
  0x45   : > { %p773_p0 = pneg %p772_p11  ;;  %p779_p9 = por %p778_p10, %p777_p3 }
  0x47   : > { %p780_p13 = pnand %p779_p9, %p773_p0 }
  0x49   : > { %783 = shalt.err (!%p780_p13)
}
  0x4a   : > { %622 = dma.hbm_to_vmem [thread:$0]  (!%p1032_p2), %s1030_s21, 32, %s144_s26, %s132_s5  }
  0x4b   : > { %p1295_p12 = scmp.ne.s32.totalorder %s1289_s29, 0 }
  0x4c   : > { %s1053_s19 = sand.u32 (!%p1295_p12), 1, %s866_s1   ;;  %p1296_p11 = scmp.ne.s32.totalorder (!%p1295_p12), %s1287_s27, 0 }
  0x4d   : > { %152 = sbr.rel (%p1295_p12) target bundleno = 463 (0x1cf), region = 28  ;;  %s595_s20 = sshll.u32 (!%p1295_p12), %s1053_s19, 1 }
  0x4e   : > { %s155_s22 = scalar_lea.sflag (!%p1295_p12), [#allocation6], %s1053_s19  ;;  %s158_s7 = scalar_lea.vmem (!%p1295_p12), [#allocation5], %s595_s20 }
  0x52   : > { %849 = dma.done.wait (%p1296_p11), %s155_s22, 32  }
  0x53   : > { %851 = vsyncadd (%p1296_p11), %s155_s22, 4294967264  ;;  %p1297_p9 = scmp.eq.s32.totalorder %s955_s25, 0 }
  0x55   : > { %853 = dma.done.wait (%p1297_p9), [#allocation9], 128   ;;  %p1298_p13 = pmov %p1297_p9 }
  0x56   : > { %v188_v0 = vlaneseq  ;;  %s1066_s29 = sld [smem:[#allocation3 + %s955_s25]]  ;;  %v1110_v14 = vld [vmem:[%s158_s7] sm:$0x3]  ;;  %s1121_s27 = scalar_lea.vmem [#allocation10], %s595_s20  ;;  %v1124_v18 = vmov 4294967295   ;;  %v1126_v19 = vmov 4294967295  }
  0x57   : > { %855 = vsyncadd (%p1298_p13), [#allocation9], 4294967168  ;;  %s1069_s21 = sld [smem:[#allocation4 + %s955_s25]] }
  0x58   : > { %v1072_v1 = vshrl.u32 %v188_v0, 7 }
  0x5a   : > { %v1075_v2 = vadd.s32 8, %v1072_v1  ;;  %v1078_v3 = vadd.s32 16, %v1072_v1  ;;  %v1081_v4 = vadd.s32 24, %v1072_v1  ;;  %v1084_v5 = vadd.s32 32, %v1072_v1 }
  0x5b   : > { %v1087_v6 = vadd.s32 40, %v1072_v1  ;;  %v1090_v7 = vadd.s32 48, %v1072_v1  ;;  %v1093_v8 = vadd.s32 56, %v1072_v1  ;;  %v1096_v9 = vadd.s32 64, %v1072_v1 }
  0x5c   : > { %v1099_v10 = vadd.s32 72, %v1072_v1  ;;  %v1102_v11 = vadd.s32 80, %v1072_v1  ;;  %v1105_v12 = vadd.s32 88, %v1072_v1  ;;  %v1108_v13 = vadd.s32 96, %v1072_v1 }
  0x5d   : > { %v1113_v15 = vadd.s32 104, %v1072_v1  ;;  %v1116_v16 = vadd.s32 112, %v1072_v1  ;;  %v1119_v17 = vadd.s32 120, %v1072_v1  ;;  %p598_p0 = scmp.le.s32.totalorder %s1069_s21, 0 }
  0x5e   : > { %s1132_s26 = smov (!%p598_p0), 0  }
  0x5f   : > { %547 = sbr.rel (%p598_p0) target bundleno = 439 (0x1b7), region = 79 }
  0x64   : > { %v1128_v20 = vmov 4294967295   ;;  %v1130_v21 = vmov 4294967295  }
  0x65 LB: >> { %v900_v22 = vmov 0   ;;  %s213_s30 = sadd.s32 %s886_s26, %s1066_s29  ;;  %v301_v46 = vsub.s32 0, %v1072_v1  ;;  %v305_v47 = vsub.s32 1, %v1072_v1  ;;  %s208_s26 = sadd.s32 1, %s886_s26   ;;  %s886_s26 = sphi %s1132_s26, %s208_s26   ;;  %v882_v21 = vphi %v1130_v21, %v1300_v21   ;;  %v878_v20 = vphi %v1128_v20, %v1299_v20  }
  0x66   : >> { %709 = vset.pattern.permute.xlu1 %v900_v22  ;;  %s1145_s5 = sshll.u32 %s213_s30, 7  ;;  %p207_p2 = scmp.ge.s32.totalorder %s208_s26, %s1069_s21 }
  0x67   : >> { %s215_s8 = sshra.s32 %s1145_s5, 7  ;;  %v1151_v49 = vrot.slane %v1110_v14, %v301_v46  ;;  %v1154_v50 = vrot.slane %v1110_v14, %v305_v47 }
  0x68   : >> { %s217_s9 = scalar_lea.vmem [#allocation8], %s215_s8 }
  0x69   : >> { %v218_v23 = vld [vmem:[%s217_s9] sm:$0xff] }
  0x6a   : >> { %219 = vxpose.xlu0.b32.start.end [1/1] (short) %v218_v23, 128 }
  0x93   : >> { %708 = vset.pattern.permute.xlu0 %v900_v22 }
  0xe6   : >> { %v235_v24 = vpop.trf.xlu0 }
  0xe7   : >> { %252 = vperm.xlu0 %708, %v235_v24  }
  0xea   : >> { %v236_v25 = vpop.trf.xlu0 }
  0xeb   : >> { %255 = vperm.xlu1 %709, %v236_v25  }
  0xee   : >> { %v237_v26 = vpop.trf.xlu0 }
  0xef   : >> { %258 = vperm.xlu1 %709, %v237_v26  }
  0xf2   : >> { %v238_v27 = vpop.trf.xlu0 }
  0xf3   : >> { %261 = vperm.xlu1 %709, %v238_v27  }
  0xf6   : >> { %v239_v28 = vpop.trf.xlu0 }
  0xf7   : >> { %264 = vperm.xlu1 %709, %v239_v28  }
  0xfa   : >> { %v240_v29 = vpop.trf.xlu0 }
  0xfb   : >> { %267 = vperm.xlu1 %709, %v240_v29  }
  0xfe   : >> { %v241_v30 = vpop.trf.xlu0 }
  0xff   : >> { %270 = vperm.xlu1 %709, %v241_v30  }
 0x102   : >> { %v242_v31 = vpop.trf.xlu0 }
 0x103   : >> { %273 = vperm.xlu1 %709, %v242_v31  }
 0x106   : >> { %v243_v32 = vpop.trf.xlu0 }
 0x107   : >> { %276 = vperm.xlu1 %709, %v243_v32  }
 0x10a   : >> { %v244_v33 = vpop.trf.xlu0 }
 0x10b   : >> { %279 = vperm.xlu1 %709, %v244_v33  }
 0x10e   : >> { %v245_v34 = vpop.trf.xlu0 }
 0x10f   : >> { %282 = vperm.xlu1 %709, %v245_v34  }
 0x112   : >> { %v246_v35 = vpop.trf.xlu0 }
 0x113   : >> { %285 = vperm.xlu1 %709, %v246_v35  }
 0x116   : >> { %v247_v36 = vpop.trf.xlu0 }
 0x117   : >> { %288 = vperm.xlu1 %709, %v247_v36  }
 0x11a   : >> { %v248_v37 = vpop.trf.xlu0 }
 0x11b   : >> { %291 = vperm.xlu1 %709, %v248_v37  }
 0x11e   : >> { %v249_v38 = vpop.trf.xlu0 }
 0x11f   : >> { %294 = vperm.xlu1 %709, %v249_v38  }
 0x122   : >> { %v250_v39 = vpop.trf.xlu0 }
 0x123   : >> { %297 = vperm.xlu1 %709, %v250_v39  }
 0x162   : >> { %v253_v51 = vpop.permute.xlu0 %252 }
 0x163   : >> { %vm307_vm2 = vcmp.eq.s32.totalorder %v253_v51, %v1151_v49  ;;  %vm308_vm3 = vcmp.eq.s32.totalorder %v253_v51, %v1154_v50 }
 0x164   : >> { %v339_v55 = vsel %vm307_vm2, %v1072_v1, 4294967295  ;;  %v340_v56 = vsel %vm308_vm3, %v1072_v1, 4294967295 }
 0x166   : >> { %v256_v40 = vpop.permute.xlu1 %255 }
 0x167   : >> { %vm309_vm6 = vcmp.eq.s32.totalorder %v256_v40, %v1151_v49  ;;  %vm310_vm7 = vcmp.eq.s32.totalorder %v256_v40, %v1154_v50 }
 0x168   : >> { %v341_v60 = vsel %vm309_vm6, %v1075_v2, 4294967295  ;;  %v342_v61 = vsel %vm310_vm7, %v1075_v2, 4294967295 }
 0x16a   : >> { %v259_v41 = vpop.permute.xlu1 %258 }
 0x16b   : >> { %vm311_vm0 = vcmp.eq.s32.totalorder %v259_v41, %v1151_v49  ;;  %vm312_vm1 = vcmp.eq.s32.totalorder %v259_v41, %v1154_v50 }
 0x16c   : >> { %v343_v53 = vsel %vm311_vm0, %v1078_v3, 4294967295  ;;  %v344_v54 = vsel %vm312_vm1, %v1078_v3, 4294967295 }
 0x16d   : >> { %vm371_vm10 = vcmp.gt.s32.totalorder %v339_v55, %v343_v53  ;;  %vm410_vm11 = vcmp.gt.s32.totalorder %v340_v56, %v344_v54 }
 0x16e   : >> { %v262_v42 = vpop.permute.xlu1 %261  ;;  %v372_v18 = vsel %vm371_vm10, %v339_v55, %v343_v53  ;;  %v411_v19 = vsel %vm410_vm11, %v340_v56, %v344_v54 }
 0x16f   : >> { %vm313_vm4 = vcmp.eq.s32.totalorder %v262_v42, %v1151_v49  ;;  %vm314_vm5 = vcmp.eq.s32.totalorder %v262_v42, %v1154_v50 }
 0x170   : >> { %v345_v57 = vsel %vm313_vm4, %v1081_v4, 4294967295  ;;  %v346_v58 = vsel %vm314_vm5, %v1081_v4, 4294967295 }
 0x171   : >> { %vm373_vm14 = vcmp.gt.s32.totalorder %v341_v60, %v345_v57  ;;  %vm412_vm15 = vcmp.gt.s32.totalorder %v342_v61, %v346_v58 }
 0x172   : >> { %v265_v43 = vpop.permute.xlu1 %264  ;;  %v374_v25 = vsel %vm373_vm14, %v341_v60, %v345_v57  ;;  %v413_v26 = vsel %vm412_vm15, %v342_v61, %v346_v58 }
 0x173   : >> { %vm315_vm8 = vcmp.eq.s32.totalorder %v265_v43, %v1151_v49  ;;  %vm316_vm9 = vcmp.eq.s32.totalorder %v265_v43, %v1154_v50 }
 0x174   : >> { %v347_v62 = vsel %vm315_vm8, %v1084_v5, 4294967295  ;;  %v348_v63 = vsel %vm316_vm9, %v1084_v5, 4294967295 }
 0x175   : >> { %vm375_vm2 = vcmp.gt.s32.totalorder %v372_v18, %v347_v62  ;;  %vm414_vm3 = vcmp.gt.s32.totalorder %v411_v19, %v348_v63 }
 0x176   : >> { %v268_v44 = vpop.permute.xlu1 %267  ;;  %v376_v29 = vsel %vm375_vm2, %v372_v18, %v347_v62  ;;  %v415_v30 = vsel %vm414_vm3, %v411_v19, %v348_v63 }
 0x177   : >> { %vm317_vm12 = vcmp.eq.s32.totalorder %v268_v44, %v1151_v49  ;;  %vm318_vm13 = vcmp.eq.s32.totalorder %v268_v44, %v1154_v50 }
 0x178   : >> { %v349_v22 = vsel %vm317_vm12, %v1087_v6, 4294967295  ;;  %v350_v23 = vsel %vm318_vm13, %v1087_v6, 4294967295 }
 0x179   : >> { %vm377_vm6 = vcmp.gt.s32.totalorder %v374_v25, %v349_v22  ;;  %vm416_vm7 = vcmp.gt.s32.totalorder %v413_v26, %v350_v23 }
 0x17a   : >> { %v271_v45 = vpop.permute.xlu1 %270  ;;  %v378_v34 = vsel %vm377_vm6, %v374_v25, %v349_v22  ;;  %v417_v35 = vsel %vm416_vm7, %v413_v26, %v350_v23 }
 0x17b   : >> { %vm319_vm0 = vcmp.eq.s32.totalorder %v271_v45, %v1151_v49  ;;  %vm320_vm1 = vcmp.eq.s32.totalorder %v271_v45, %v1154_v50 }
 0x17c   : >> { %v351_v27 = vsel %vm319_vm0, %v1090_v7, 4294967295  ;;  %v352_v28 = vsel %vm320_vm1, %v1090_v7, 4294967295 }
 0x17d   : >> { %vm379_vm10 = vcmp.gt.s32.totalorder %v376_v29, %v351_v27  ;;  %vm418_vm11 = vcmp.gt.s32.totalorder %v415_v30, %v352_v28 }
 0x17e   : >> { %v274_v48 = vpop.permute.xlu1 %273  ;;  %v380_v38 = vsel %vm379_vm10, %v376_v29, %v351_v27  ;;  %v419_v39 = vsel %vm418_vm11, %v415_v30, %v352_v28 }
 0x17f   : >> { %vm321_vm4 = vcmp.eq.s32.totalorder %v274_v48, %v1151_v49  ;;  %vm322_vm5 = vcmp.eq.s32.totalorder %v274_v48, %v1154_v50 }
 0x180   : >> { %v353_v31 = vsel %vm321_vm4, %v1093_v8, 4294967295  ;;  %v354_v32 = vsel %vm322_vm5, %v1093_v8, 4294967295 }
 0x181   : >> { %vm381_vm14 = vcmp.gt.s32.totalorder %v378_v34, %v353_v31  ;;  %vm420_vm15 = vcmp.gt.s32.totalorder %v417_v35, %v354_v32 }
 0x182   : >> { %v277_v52 = vpop.permute.xlu1 %276  ;;  %v382_v43 = vsel %vm381_vm14, %v378_v34, %v353_v31  ;;  %v421_v44 = vsel %vm420_vm15, %v417_v35, %v354_v32 }
 0x183   : >> { %vm323_vm8 = vcmp.eq.s32.totalorder %v277_v52, %v1151_v49  ;;  %vm324_vm9 = vcmp.eq.s32.totalorder %v277_v52, %v1154_v50 }
 0x184   : >> { %v355_v36 = vsel %vm323_vm8, %v1096_v9, 4294967295  ;;  %v356_v37 = vsel %vm324_vm9, %v1096_v9, 4294967295 }
 0x185   : >> { %vm383_vm2 = vcmp.gt.s32.totalorder %v380_v38, %v355_v36  ;;  %vm422_vm3 = vcmp.gt.s32.totalorder %v419_v39, %v356_v37 }
 0x186   : >> { %v280_v59 = vpop.permute.xlu1 %279  ;;  %v384_v47 = vsel %vm383_vm2, %v380_v38, %v355_v36  ;;  %v423_v48 = vsel %vm422_vm3, %v419_v39, %v356_v37 }
 0x187   : >> { %vm325_vm12 = vcmp.eq.s32.totalorder %v280_v59, %v1151_v49  ;;  %vm326_vm13 = vcmp.eq.s32.totalorder %v280_v59, %v1154_v50 }
 0x188   : >> { %v357_v40 = vsel %vm325_vm12, %v1099_v10, 4294967295  ;;  %v358_v41 = vsel %vm326_vm13, %v1099_v10, 4294967295 }
 0x189   : >> { %vm385_vm6 = vcmp.gt.s32.totalorder %v382_v43, %v357_v40  ;;  %vm424_vm7 = vcmp.gt.s32.totalorder %v421_v44, %v358_v41 }
 0x18a   : >> { %v283_v24 = vpop.permute.xlu1 %282  ;;  %v386_v54 = vsel %vm385_vm6, %v382_v43, %v357_v40  ;;  %v425_v55 = vsel %vm424_vm7, %v421_v44, %v358_v41  ;;  %v451_v44 = vstv %s1145_s5 }
 0x18b   : >> { %vm327_vm0 = vcmp.eq.s32.totalorder %v283_v24, %v1151_v49  ;;  %vm328_vm1 = vcmp.eq.s32.totalorder %v283_v24, %v1154_v50 }
 0x18c   : >> { %v359_v45 = vsel %vm327_vm0, %v1102_v11, 4294967295  ;;  %v360_v46 = vsel %vm328_vm1, %v1102_v11, 4294967295 }
 0x18d   : >> { %vm387_vm10 = vcmp.gt.s32.totalorder %v384_v47, %v359_v45  ;;  %vm426_vm11 = vcmp.gt.s32.totalorder %v423_v48, %v360_v46 }
 0x18e   : >> { %v286_v33 = vpop.permute.xlu1 %285  ;;  %v388_v58 = vsel %vm387_vm10, %v384_v47, %v359_v45  ;;  %v427_v59 = vsel %vm426_vm11, %v423_v48, %v360_v46 }
 0x18f   : >> { %vm329_vm4 = vcmp.eq.s32.totalorder %v286_v33, %v1151_v49  ;;  %vm330_vm5 = vcmp.eq.s32.totalorder %v286_v33, %v1154_v50 }
 0x190   : >> { %v361_v51 = vsel %vm329_vm4, %v1105_v12, 4294967295  ;;  %v362_v52 = vsel %vm330_vm5, %v1105_v12, 4294967295 }
 0x191   : >> { %vm389_vm14 = vcmp.gt.s32.totalorder %v386_v54, %v361_v51  ;;  %vm428_vm15 = vcmp.gt.s32.totalorder %v425_v55, %v362_v52 }
 0x192   : >> { %v289_v42 = vpop.permute.xlu1 %288  ;;  %v390_v63 = vsel %vm389_vm14, %v386_v54, %v361_v51  ;;  %v429_v18 = vsel %vm428_vm15, %v425_v55, %v362_v52 }
 0x193   : >> { %vm331_vm8 = vcmp.eq.s32.totalorder %v289_v42, %v1151_v49  ;;  %vm332_vm9 = vcmp.eq.s32.totalorder %v289_v42, %v1154_v50 }
 0x194   : >> { %v363_v56 = vsel %vm331_vm8, %v1108_v13, 4294967295  ;;  %v364_v57 = vsel %vm332_vm9, %v1108_v13, 4294967295 }
 0x195   : >> { %vm391_vm0 = vcmp.gt.s32.totalorder %v388_v58, %v363_v56  ;;  %vm430_vm1 = vcmp.gt.s32.totalorder %v427_v59, %v364_v57 }
 0x196   : >> { %v292_v53 = vpop.permute.xlu1 %291  ;;  %v392_v23 = vsel %vm391_vm0, %v388_v58, %v363_v56  ;;  %v431_v24 = vsel %vm430_vm1, %v427_v59, %v364_v57 }
 0x197   : >> { %vm333_vm12 = vcmp.eq.s32.totalorder %v292_v53, %v1151_v49  ;;  %vm334_vm13 = vcmp.eq.s32.totalorder %v292_v53, %v1154_v50 }
 0x198   : >> { %v365_v60 = vsel %vm333_vm12, %v1113_v15, 4294967295  ;;  %v366_v61 = vsel %vm334_vm13, %v1113_v15, 4294967295 }
 0x199   : >> { %vm393_vm4 = vcmp.gt.s32.totalorder %v390_v63, %v365_v60  ;;  %vm432_vm5 = vcmp.gt.s32.totalorder %v429_v18, %v366_v61 }
 0x19a   : >> { %v295_v62 = vpop.permute.xlu1 %294  ;;  %v394_v26 = vsel %vm393_vm4, %v390_v63, %v365_v60  ;;  %v433_v27 = vsel %vm432_vm5, %v429_v18, %v366_v61 }
 0x19b   : >> { %vm335_vm2 = vcmp.eq.s32.totalorder %v295_v62, %v1151_v49  ;;  %vm336_vm3 = vcmp.eq.s32.totalorder %v295_v62, %v1154_v50 }
 0x19c   : >> { %v367_v19 = vsel %vm335_vm2, %v1116_v16, 4294967295  ;;  %v368_v22 = vsel %vm336_vm3, %v1116_v16, 4294967295 }
 0x19d   : >> { %vm395_vm6 = vcmp.gt.s32.totalorder %v392_v23, %v367_v19  ;;  %vm434_vm7 = vcmp.gt.s32.totalorder %v431_v24, %v368_v22 }
 0x19e   : >> { %v298_v25 = vpop.permute.xlu1 %297  ;;  %v396_v30 = vsel %vm395_vm6, %v392_v23, %v367_v19  ;;  %v435_v31 = vsel %vm434_vm7, %v431_v24, %v368_v22 }
 0x19f   : >> { %vm337_vm8 = vcmp.eq.s32.totalorder %v298_v25, %v1151_v49  ;;  %vm338_vm9 = vcmp.eq.s32.totalorder %v298_v25, %v1154_v50 }
 0x1a0   : >> { %v369_v28 = vsel %vm337_vm8, %v1119_v17, 4294967295  ;;  %v370_v29 = vsel %vm338_vm9, %v1119_v17, 4294967295 }
 0x1a1   : >> { %vm397_vm10 = vcmp.gt.s32.totalorder %v394_v26, %v369_v28  ;;  %vm436_vm11 = vcmp.gt.s32.totalorder %v433_v27, %v370_v29 }
 0x1a2   : >> { %v398_v32 = vsel %vm397_vm10, %v394_v26, %v369_v28  ;;  %v437_v33 = vsel %vm436_vm11, %v433_v27, %v370_v29 }
 0x1a3   : >> { %vm399_vm12 = vcmp.gt.s32.totalorder %v396_v30, %v398_v32  ;;  %vm438_vm13 = vcmp.gt.s32.totalorder %v435_v31, %v437_v33 }
 0x1a4   : >> { %v400_v34 = vsel %vm399_vm12, %v396_v30, %v398_v32  ;;  %v439_v35 = vsel %vm438_vm13, %v435_v31, %v437_v33 }
 0x1a5   : >> { %v401_v49 = vrot.slane %v400_v34, 4  ;;  %v440_v36 = vrot.slane %v439_v35, 4 }
 0x1a7   : >> { %vm402_vm14 = vcmp.gt.s32.totalorder %v400_v34, %v401_v49  ;;  %vm441_vm15 = vcmp.gt.s32.totalorder %v439_v35, %v440_v36 }
 0x1a8   : >> { %v403_v50 = vsel %vm402_vm14, %v400_v34, %v401_v49  ;;  %v442_v37 = vsel %vm441_vm15, %v439_v35, %v440_v36 }
 0x1a9   : >> { %v404_v38 = vrot.slane %v403_v50, 2  ;;  %v443_v39 = vrot.slane %v442_v37, 2 }
 0x1ab   : >> { %vm405_vm0 = vcmp.gt.s32.totalorder %v403_v50, %v404_v38  ;;  %vm444_vm1 = vcmp.gt.s32.totalorder %v442_v37, %v443_v39 }
 0x1ac   : >> { %v406_v40 = vsel %vm405_vm0, %v403_v50, %v404_v38  ;;  %v445_v41 = vsel %vm444_vm1, %v442_v37, %v443_v39 }
 0x1ad   : >> { %v407_v42 = vrot.slane %v406_v40, 1  ;;  %v446_v43 = vrot.slane %v445_v41, 1 }
 0x1af   : >> { %vm408_vm2 = vcmp.gt.s32.totalorder %v406_v40, %v407_v42  ;;  %vm447_vm3 = vcmp.gt.s32.totalorder %v445_v41, %v446_v43 }
 0x1b0   : >> { %v409_v45 = vsel %vm408_vm2, %v406_v40, %v407_v42  ;;  %v448_v46 = vsel %vm447_vm3, %v445_v41, %v446_v43 }
 0x1b1   : >> { %vm449_vm4 = vcmp.ge.s32.totalorder %v409_v45, 0  ;;  %vm450_vm5 = vcmp.ge.s32.totalorder %v448_v46, 0  ;;  %v452_v47 = vadd.s32 %v451_v44, %v409_v45  ;;  %v453_v48 = vadd.s32 %v451_v44, %v448_v46 }
 0x1b2   : > { %210 = sbr.rel (!%p207_p2) target bundleno = 101 (0x65), region = 85 }
 0x1b3   : >> { %v454_v51 = vsel %vm449_vm4, %v452_v47, 4294967295  ;;  %v455_v52 = vsel %vm450_vm5, %v453_v48, 4294967295 }
 0x1b4   : >> { %vm456_vm6 = vcmp.gt.s32.totalorder %v882_v21, %v454_v51  ;;  %vm458_vm7 = vcmp.gt.s32.totalorder %v878_v20, %v455_v52 }
 0x1b5   : >> { %v457_v53 = vsel %vm456_vm6, %v882_v21, %v454_v51   ;;  %v459_v54 = vsel %vm458_vm7, %v878_v20, %v455_v52  }
 0x1b6   : >> { %v1299_v20 = vmov %v459_v54  ;;  %v1300_v21 = vmov %v457_v53  ;;  %v1301_v18 = vmov (%p207_p2), %v459_v54  ;;  %v1302_v19 = vmov (%p207_p2), %v457_v53 }
 0x1b7 PF: > { %v901_v21 = vmov 1966171168   ;;  %v460_v56 = vcombine.low %v894_v19, %v890_v18  ;;  %s606_s10 = sshll.u32 %s955_s25, 5  ;;  %s495_s11 = sshll.u32 %s1121_s27, 4  ;;  %vm477_vm8 = vcmp.lt.s32.totalorder %v188_v0, 256  ;;  %v894_v19 = vphi %v1126_v19, %v1302_v19   ;;  %v890_v18 = vphi %v1124_v18, %v1301_v18   ;;  %s496_s11 = int_to_ptr.vmem [resolvable:$true] %s495_s11 }
 0x1b8   : > { %v462_v55 = vunpack.c.l.s4 %v901_v21  ;;  %s493_s16 = scalar_lea.hbm %s1281_s4, %s606_s10  ;;  %s481_s17 = scalar_lea.sflag [#allocation7], %s1053_s19 }
 0x1b9   : > { %s784_s18 = scalar_lea.vmem %s496_s11, 32  ;;  %p1303_p1 = scmp.ne.s32.totalorder %s1293_s15, 0 }
 0x1ba   : > { %v463_v57 = vunpack.c.0.s8 %v462_v55  ;;  %p785_p4 = scmp.ne.s32.totalorder %s496_s11, %s784_s18  ;;  %s902_s20 = smov [#allocation10]  }
 0x1bb   : > { %s788_s22 = sshll.u32 %s902_s20, 4  ;;  %s789_s22 = int_to_ptr.vmem [resolvable:$false] %s788_s22 }
 0x1bc   : > { %v466_v2 = vsub.s32 %v463_v57, %v1072_v1  ;;  %p786_p6 = pnand %p785_p4, %p1303_p1  ;;  %s790_s25 = scalar_lea.vmem %s789_s22, 64 }
 0x1bd   : > { %p791_p5 = scmp.lt.s32.totalorder %s496_s11, %s789_s22  ;;  %p792_p8 = scmp.lt.s32.totalorder %s790_s25, %s784_s18 }
 0x1be   : > { %v467_v3 = vrot.slane %v460_v56, %v466_v2  ;;  %p787_p7 = pneg %p786_p6 }
 0x1bf   : > { %p793_p3 = por %p792_p8, %p791_p5 }
 0x1c0   : > { %v474_v4 = vrot.slane %v467_v3, %v466_v2 }
 0x1c1   : > { %p794_p10 = pnand %p793_p3, %p787_p7 }
 0x1c2   : > { %479 = vst.msk [vmem:[%s1121_s27] sm:$0x3] %vm477_vm8, %v474_v4 }
 0x1c3   : > { %797 = shalt.err (!%p794_p10)
}
 0x1c4   : > { %s798_s7 = scalar_lea.hbm %s493_s16, 32  ;;  %s802_s21 = scalar_lea.hbm %s1281_s4, 64 }
 0x1c5   : > { %p799_p12 = scmp.ne.s32.totalorder %s493_s16, %s798_s7  ;;  %p803_p13 = scmp.lt.s32.totalorder %s493_s16, %s1281_s4 }
 0x1c6   : > { %p804_p0 = scmp.lt.s32.totalorder %s802_s21, %s798_s7 }
 0x1c7   : > { %p800_p11 = pnand %p799_p12, %p1303_p1 }
 0x1c8   : > { %p805_p2 = por %p804_p0, %p803_p13 }
 0x1c9   : > { %p801_p9 = pneg %p800_p11 }
 0x1cb   : > { %p806_p4 = pnand %p805_p2, %p801_p9 }
 0x1cd   : > { %809 = shalt.err (!%p806_p4)
}
 0x1ce   : > { %613 = dma.vmem_to_hbm [thread:$0]  (%p1303_p1), %s496_s11, 32, %s493_s16, %s481_s17  }
 0x1cf PF: > { %s507_s30 = sand.u32 1, %s862_s0   ;;  %p1304_p6 = scmp.ne.s32.totalorder %s1288_s28, 0 }
 0x1d0   : > { %p1305_p7 = scmp.ge.s32.totalorder %s874_s24, 2  ;;  %s508_s5 = scalar_lea.sflag [#allocation7], %s507_s30 }
 0x1d2   : > { %p624_p5 = pnand %p1305_p7, %p1304_p6 }
 0x1d4   : > { %p625_p8 = pneg %p624_p5 }
 0x1d6   : > { %857 = dma.done.wait (%p625_p8), %s508_s5, 32  }
 0x1d7   : > { %859 = vsyncadd (%p625_p8), %s508_s5, 4294967264  ;;  %p26_p3 = scmp.ge.s32.totalorder %s982_s6, 4   ;;  %s1306_s0 = smov %s866_s1 }
 0x1d8   : > { %s1307_s1 = smov %s870_s23  ;;  %s1308_s23 = smov %s1009_s14 }
 0x1d9   : > { %s1309_s24 = smov %s982_s6  ;;  %28 = sbr.rel (!%p26_p3) target bundleno = 22 (0x16), region = 96 }
 0x1de   :  { %513 = vsyncpa [#allocation6], 1 }
 0x1df   :  { %515 = vsyncpa [#allocation6 + $0x1], 1 }
 0x1e0   :  { %516 = vsyncpa [#allocation9], 1 }
 0x1e1   :  { %517 = vsyncpa [#allocation7], 1 }
 0x1e2   :  { %519 = vsyncpa [#allocation7 + $0x1], 1 }

</bundles_post_ra>
